<compile_context>
chip_gen: v6e
topology: v6e:2x2x1
jax: 0.10.0
libtpu: 0.0.40
codegen_flags: <defaults>
</compile_context>

<pallas_src>
import jax
import jax.numpy as jnp
from jax.experimental import pallas as pl
from jax.experimental.pallas import tpu as pltpu

FACTOR_MF = 32
FACTOR_MLP = 32                       # layers[0] / 2
LAYERS = [64, 32, 16, 8]
PACKED_FEATURES = 2 * FACTOR_MLP + 2 * FACTOR_MF   # = 128, exactly one vreg lane-width
TILE_B_MAX = 2048                     # 128x2048 f32 tile = 1 MiB; x2 buffers fits every gen


def _neumf_kernel(x_ref, w1_ref, b1_ref, w2_ref, b2_ref, w3_ref, b3_ref,
                  wa_mlp_ref, wa_mf_ref, ba_ref, out_ref):
    f32 = jnp.float32

    # Packed, feature-major embedding tile: (128, TILE_B). Static sublane slices.
    x_mlp = x_ref[0:2 * FACTOR_MLP, :]                                   # (64, TILE_B)
    u_mf = x_ref[2 * FACTOR_MLP:2 * FACTOR_MLP + FACTOR_MF, :].astype(f32)   # (32, TILE_B)
    i_mf = x_ref[2 * FACTOR_MLP + FACTOR_MF:, :].astype(f32)                 # (32, TILE_B)

    # --- MLP tower (transposed): h = relu(W @ h + b), W stored as (out, in) ---
    h = jnp.dot(w1_ref[...], x_mlp, preferred_element_type=f32) + b1_ref[...].astype(f32)
    h = jnp.maximum(h, 0.0)
    h = jnp.dot(w2_ref[...], h, preferred_element_type=f32) + b2_ref[...].astype(f32)
    h = jnp.maximum(h, 0.0)
    h = jnp.dot(w3_ref[...], h, preferred_element_type=f32) + b3_ref[...].astype(f32)
    h = jnp.maximum(h, 0.0)                                              # (8, TILE_B)

    # --- GMF branch (pure VPU) ---
    mf = u_mf * i_mf                                                     # (32, TILE_B)

    # --- affine head: width-1 output -> keep it OFF the MXU.
    # logits = wa_mlp . h + wa_mf . mf + ba  (broadcast-mul + sublane reduce on XLU)
    logits = (jnp.sum(wa_mlp_ref[...].astype(f32) * h, axis=0, keepdims=True)
              + jnp.sum(wa_mf_ref[...].astype(f32) * mf, axis=0, keepdims=True)
              + ba_ref[...].astype(f32))                                 # (1, TILE_B)
    out_ref[...] = jax.nn.sigmoid(logits)                                # lane-dense store


def _round_up(x, m):
    return ((x + m - 1) // m) * m


def neumf_forward(params, user_indices, item_indices, ratings, *, tile_b_max=TILE_B_MAX):
    # --- embedding gathers (data-dependent; plain-JAX glue) ---
    # TODO(synk): fuse the gather into the kernel (scalar-prefetched indices +
    # manual row DMA from HBM-resident tables) to cut HBM traffic further.
    u_mlp = jnp.take(params["emb_user_mlp"], user_indices, axis=0)
    i_mlp = jnp.take(params["emb_item_mlp"], item_indices, axis=0)
    u_mf = jnp.take(params["emb_user_mf"], user_indices, axis=0)
    i_mf = jnp.take(params["emb_item_mf"], item_indices, axis=0)

    # One lane-dense, feature-major slab: (128, B), batch on the lane axis.
    x = jnp.concatenate([u_mlp, i_mlp, u_mf, i_mf], axis=-1).T

    B = user_indices.shape[0]
    tile_b = min(tile_b_max, _round_up(B, 128))
    b_pad = _round_up(B, tile_b)
    if b_pad != B:
        x = jnp.pad(x, ((0, 0), (0, b_pad - B)))

    def batch_tile(shape):                    # tiled over the batch (lane) axis
        return pl.BlockSpec(shape, lambda i: (0, i))

    def resident(shape):                      # same block every step -> stays in VMEM
        return pl.BlockSpec(shape, lambda i: (0, 0))

    out = pl.pallas_call(
        _neumf_kernel,
        out_shape=jax.ShapeDtypeStruct((1, b_pad), jnp.float32),
        grid_spec=pltpu.PrefetchScalarGridSpec(
            num_scalar_prefetch=0,
            grid=(b_pad // tile_b,),
            in_specs=[
                batch_tile((PACKED_FEATURES, tile_b)),               # packed embeddings
                resident((LAYERS[1], LAYERS[0])), resident((LAYERS[1], 1)),   # w1, b1
                resident((LAYERS[2], LAYERS[1])), resident((LAYERS[2], 1)),   # w2, b2
                resident((LAYERS[3], LAYERS[2])), resident((LAYERS[3], 1)),   # w3, b3
                resident((LAYERS[3], 1)),                                     # wa_mlp
                resident((FACTOR_MF, 1)),                                     # wa_mf
                resident((1, 1)),                                             # ba
            ],
            out_specs=batch_tile((1, tile_b)),
        ),
        compiler_params=pltpu.CompilerParams(
            dimension_semantics=("parallel",),
        ),
    )(x, params["w1"], params["b1"], params["w2"], params["b2"],
      params["w3"], params["b3"], params["wa_mlp"], params["wa_mf"], params["ba"])

    rating = out[0, :B].reshape(B, 1)
    return rating, ratings.astype(jnp.float32)


def _xavier_uniform(key, out_features, in_features):
    limit = (6.0 / (in_features + out_features)) ** 0.5
    # PyTorch nn.Linear layout: (out_features, in_features)
    return jax.random.uniform(key, (out_features, in_features), jnp.float32, -limit, limit)


def init_params(key, num_users, num_items, dtype=jnp.float32):
    keys = jax.random.split(key, 8)
    params = {
        "emb_user_mlp": 0.01 * jax.random.normal(keys[0], (num_users, FACTOR_MLP), jnp.float32),
        "emb_item_mlp": 0.01 * jax.random.normal(keys[1], (num_items, FACTOR_MLP), jnp.float32),
        "emb_user_mf": 0.01 * jax.random.normal(keys[2], (num_users, FACTOR_MF), jnp.float32),
        "emb_item_mf": 0.01 * jax.random.normal(keys[3], (num_items, FACTOR_MF), jnp.float32),
        # fc layers: Linear(64,32), Linear(32,16), Linear(16,8) — (out, in) layout
        "w1": _xavier_uniform(keys[4], LAYERS[1], LAYERS[0]),
        "b1": jnp.zeros((LAYERS[1], 1), jnp.float32),
        "w2": _xavier_uniform(keys[5], LAYERS[2], LAYERS[1]),
        "b2": jnp.zeros((LAYERS[2], 1), jnp.float32),
        "w3": _xavier_uniform(keys[6], LAYERS[3], LAYERS[2]),
        "b3": jnp.zeros((LAYERS[3], 1), jnp.float32),
        "ba": jnp.zeros((1, 1), jnp.float32),
    }
    # affine_output: Linear(8 + 32, 1); split into MLP / MF parts, stored as columns.
    wa = _xavier_uniform(keys[7], 1, LAYERS[-1] + FACTOR_MF)              # (1, 40)
    params["wa_mlp"] = wa[:, :LAYERS[-1]].T                               # (8, 1)
    params["wa_mf"] = wa[:, LAYERS[-1]:].T                                # (32, 1)
    # Optional bf16 storage for HBM-bound deployments (kernel accumulates in f32).
    if dtype != jnp.float32:
        params = jax.tree_util.tree_map(lambda a: a.astype(dtype), params)
    return params


def _neumf_reference(params, user_indices, item_indices):
    f32 = jnp.float32
    u_mlp = jnp.take(params["emb_user_mlp"], user_indices, axis=0).astype(f32)
    i_mlp = jnp.take(params["emb_item_mlp"], item_indices, axis=0).astype(f32)
    u_mf = jnp.take(params["emb_user_mf"], user_indices, axis=0).astype(f32)
    i_mf = jnp.take(params["emb_item_mf"], item_indices, axis=0).astype(f32)
    h = jnp.concatenate([u_mlp, i_mlp], axis=-1)
    h = jax.nn.relu(h @ params["w1"].astype(f32).T + params["b1"].astype(f32)[:, 0])
    h = jax.nn.relu(h @ params["w2"].astype(f32).T + params["b2"].astype(f32)[:, 0])
    h = jax.nn.relu(h @ params["w3"].astype(f32).T + params["b3"].astype(f32)[:, 0])
    mf = u_mf * i_mf
    v = jnp.concatenate([h, mf], axis=-1)
    wa = jnp.concatenate([params["wa_mlp"], params["wa_mf"]], axis=0).astype(f32)
    logits = v @ wa + params["ba"].astype(f32)[0, 0]
    return jax.nn.sigmoid(logits)


if __name__ == "__main__":
    key = jax.random.PRNGKey(0)
    k_param, k_user, k_item, k_rate = jax.random.split(key, 4)

    num_users, num_items, batch = 50, 100, 8
    params = init_params(k_param, num_users, num_items)

    user_indices = jax.random.randint(k_user, (batch,), 0, num_users, jnp.int32)
    item_indices = jax.random.randint(k_item, (batch,), 0, num_items, jnp.int32)
    ratings = jax.random.randint(k_rate, (batch,), 0, 6, jnp.int32)

    rating, ratings_f = jax.jit(neumf_forward)(params, user_indices, item_indices, ratings)
    jax.block_until_ready((rating, ratings_f))

    assert rating.shape == (batch, 1) and rating.dtype == jnp.float32
    assert ratings_f.shape == (batch,) and ratings_f.dtype == jnp.float32

    ref = _neumf_reference(params, user_indices, item_indices)
    assert jnp.allclose(rating, ref, atol=1e-5, rtol=1e-5), float(jnp.max(jnp.abs(rating - ref)))
    print("KERNEL_OK")
</pallas_src>

<mosaic_0001>
module attributes {stable_mosaic.version = 11 : i64} {
  func.func @_neumf_kernel(%arg0: i32, %arg1: memref<128x128xf32, #tpu.memory_space<vmem>>, %arg2: memref<32x64xf32, #tpu.memory_space<vmem>>, %arg3: memref<32x1xf32, #tpu.memory_space<vmem>>, %arg4: memref<16x32xf32, #tpu.memory_space<vmem>>, %arg5: memref<16x1xf32, #tpu.memory_space<vmem>>, %arg6: memref<8x16xf32, #tpu.memory_space<vmem>>, %arg7: memref<8x1xf32, #tpu.memory_space<vmem>>, %arg8: memref<8x1xf32, #tpu.memory_space<vmem>>, %arg9: memref<32x1xf32, #tpu.memory_space<vmem>>, %arg10: memref<1x1xf32, #tpu.memory_space<vmem>>, %arg11: memref<1x128xf32, #tpu.memory_space<vmem>>) attributes {dimension_semantics = [#tpu.dimension_semantics<parallel>], iteration_bounds = array<i64: 1>, scalar_prefetch = 0 : i64, scratch_operands = 0 : i64, tpu.core_type = #tpu.core_type<tc>, window_params = [{transform_indices = @transform_0, window_bounds = array<i64: 128, 128>}, {pipeline_mode = #tpu.pipeline_mode<synchronous>, transform_indices = @transform_1, window_bounds = array<i64: 32, 64>}, {pipeline_mode = #tpu.pipeline_mode<synchronous>, transform_indices = @transform_2, window_bounds = array<i64: 32, 1>}, {pipeline_mode = #tpu.pipeline_mode<synchronous>, transform_indices = @transform_3, window_bounds = array<i64: 16, 32>}, {pipeline_mode = #tpu.pipeline_mode<synchronous>, transform_indices = @transform_4, window_bounds = array<i64: 16, 1>}, {pipeline_mode = #tpu.pipeline_mode<synchronous>, transform_indices = @transform_5, window_bounds = array<i64: 8, 16>}, {pipeline_mode = #tpu.pipeline_mode<synchronous>, transform_indices = @transform_6, window_bounds = array<i64: 8, 1>}, {pipeline_mode = #tpu.pipeline_mode<synchronous>, transform_indices = @transform_7, window_bounds = array<i64: 8, 1>}, {pipeline_mode = #tpu.pipeline_mode<synchronous>, transform_indices = @transform_8, window_bounds = array<i64: 32, 1>}, {pipeline_mode = #tpu.pipeline_mode<synchronous>, transform_indices = @transform_9, window_bounds = array<i64: 1, 1>}, {transform_indices = @transform_10, window_bounds = array<i64: 1, 128>}]} {
    %c0 = arith.constant 0 : index
    %c0_0 = arith.constant 0 : index
    %0 = vector.load %arg1[%c0, %c0_0] : memref<128x128xf32, #tpu.memory_space<vmem>>, vector<64x128xf32>
    %c64 = arith.constant 64 : index
    %c0_1 = arith.constant 0 : index
    %1 = vector.load %arg1[%c64, %c0_1] : memref<128x128xf32, #tpu.memory_space<vmem>>, vector<32x128xf32>
    %c96 = arith.constant 96 : index
    %c0_2 = arith.constant 0 : index
    %2 = vector.load %arg1[%c96, %c0_2] : memref<128x128xf32, #tpu.memory_space<vmem>>, vector<32x128xf32>
    %c0_3 = arith.constant 0 : index
    %c0_4 = arith.constant 0 : index
    %3 = vector.load %arg2[%c0_3, %c0_4] : memref<32x64xf32, #tpu.memory_space<vmem>>, vector<32x64xf32>
    %cst = arith.constant dense<0.000000e+00> : vector<32x128xf32>
    %4 = tpu.matmul %3, %0, %cst {dimension_numbers = #tpu.dot_dimension_numbers<[1], [0], [0], [1], [0, 0, 1, 1], [], []>} : vector<32x64xf32>, vector<64x128xf32>, vector<32x128xf32> -> vector<32x128xf32>
    %c0_5 = arith.constant 0 : index
    %c0_6 = arith.constant 0 : index
    %5 = vector.load %arg3[%c0_5, %c0_6] : memref<32x1xf32, #tpu.memory_space<vmem>>, vector<32x1xf32>
    %6 = vector.broadcast %5 : vector<32x1xf32> to vector<32x128xf32>
    %7 = arith.addf %4, %6 : vector<32x128xf32>
    %cst_7 = arith.constant 0.000000e+00 : f32
    %8 = vector.broadcast %cst_7 : f32 to vector<32x128xf32>
    %9 = arith.maximumf %7, %8 : vector<32x128xf32>
    %c0_8 = arith.constant 0 : index
    %c0_9 = arith.constant 0 : index
    %10 = vector.load %arg4[%c0_8, %c0_9] : memref<16x32xf32, #tpu.memory_space<vmem>>, vector<16x32xf32>
    %cst_10 = arith.constant dense<0.000000e+00> : vector<16x128xf32>
    %11 = tpu.matmul %10, %9, %cst_10 {dimension_numbers = #tpu.dot_dimension_numbers<[1], [0], [0], [1], [0, 0, 1, 1], [], []>} : vector<16x32xf32>, vector<32x128xf32>, vector<16x128xf32> -> vector<16x128xf32>
    %c0_11 = arith.constant 0 : index
    %c0_12 = arith.constant 0 : index
    %12 = vector.load %arg5[%c0_11, %c0_12] : memref<16x1xf32, #tpu.memory_space<vmem>>, vector<16x1xf32>
    %13 = vector.broadcast %12 : vector<16x1xf32> to vector<16x128xf32>
    %14 = arith.addf %11, %13 : vector<16x128xf32>
    %cst_13 = arith.constant 0.000000e+00 : f32
    %15 = vector.broadcast %cst_13 : f32 to vector<16x128xf32>
    %16 = arith.maximumf %14, %15 : vector<16x128xf32>
    %c0_14 = arith.constant 0 : index
    %c0_15 = arith.constant 0 : index
    %17 = vector.load %arg6[%c0_14, %c0_15] : memref<8x16xf32, #tpu.memory_space<vmem>>, vector<8x16xf32>
    %cst_16 = arith.constant dense<0.000000e+00> : vector<8x128xf32>
    %18 = tpu.matmul %17, %16, %cst_16 {dimension_numbers = #tpu.dot_dimension_numbers<[1], [0], [0], [1], [0, 0, 1, 1], [], []>} : vector<8x16xf32>, vector<16x128xf32>, vector<8x128xf32> -> vector<8x128xf32>
    %c0_17 = arith.constant 0 : index
    %c0_18 = arith.constant 0 : index
    %19 = vector.load %arg7[%c0_17, %c0_18] : memref<8x1xf32, #tpu.memory_space<vmem>>, vector<8x1xf32>
    %20 = vector.broadcast %19 : vector<8x1xf32> to vector<8x128xf32>
    %21 = arith.addf %18, %20 : vector<8x128xf32>
    %cst_19 = arith.constant 0.000000e+00 : f32
    %22 = vector.broadcast %cst_19 : f32 to vector<8x128xf32>
    %23 = arith.maximumf %21, %22 : vector<8x128xf32>
    %24 = arith.mulf %1, %2 : vector<32x128xf32>
    %c0_20 = arith.constant 0 : index
    %c0_21 = arith.constant 0 : index
    %25 = vector.load %arg8[%c0_20, %c0_21] : memref<8x1xf32, #tpu.memory_space<vmem>>, vector<8x1xf32>
    %26 = vector.broadcast %25 : vector<8x1xf32> to vector<8x128xf32>
    %27 = arith.mulf %26, %23 : vector<8x128xf32>
    %cst_22 = arith.constant dense<0.000000e+00> : vector<128xf32>
    %28 = vector.multi_reduction <add>, %27, %cst_22 [0] : vector<8x128xf32> to vector<128xf32>
    %29 = vector.shape_cast %28 : vector<128xf32> to vector<1x128xf32>
    %c0_23 = arith.constant 0 : index
    %c0_24 = arith.constant 0 : index
    %30 = vector.load %arg9[%c0_23, %c0_24] : memref<32x1xf32, #tpu.memory_space<vmem>>, vector<32x1xf32>
    %31 = vector.broadcast %30 : vector<32x1xf32> to vector<32x128xf32>
    %32 = arith.mulf %31, %24 : vector<32x128xf32>
    %cst_25 = arith.constant dense<0.000000e+00> : vector<128xf32>
    %33 = vector.multi_reduction <add>, %32, %cst_25 [0] : vector<32x128xf32> to vector<128xf32>
    %34 = vector.shape_cast %33 : vector<128xf32> to vector<1x128xf32>
    %35 = arith.addf %29, %34 : vector<1x128xf32>
    %c0_26 = arith.constant 0 : index
    %c0_27 = arith.constant 0 : index
    %36 = vector.load %arg10[%c0_26, %c0_27] : memref<1x1xf32, #tpu.memory_space<vmem>>, vector<1x1xf32>
    %37 = vector.broadcast %36 : vector<1x1xf32> to vector<1x128xf32>
    %38 = arith.addf %35, %37 : vector<1x128xf32>
    %39 = arith.negf %38 : vector<1x128xf32>
    %40 = math.exp %39 : vector<1x128xf32>
    %cst_28 = arith.constant 1.000000e+00 : f32
    %41 = vector.broadcast %cst_28 : f32 to vector<1x128xf32>
    %42 = arith.addf %41, %40 : vector<1x128xf32>
    %43 = arith.divf %41, %42 : vector<1x128xf32>
    %c0_29 = arith.constant 0 : index
    %c0_30 = arith.constant 0 : index
    %44 = vector.load %arg11[%c0_29, %c0_30] : memref<1x128xf32, #tpu.memory_space<vmem>>, vector<1x128xf32>
    tpu.vector_store %arg11[%c0_29, %c0_30], %43 {strides = array<i32>} : memref<1x128xf32, #tpu.memory_space<vmem>>, vector<1x128xf32>,
    return
  }
  func.func @transform_0(%arg0: i32) -> (i32, i32) {
    %c0_i32 = arith.constant 0 : i32
    %c0_i32_0 = arith.constant 0 : i32
    return %c0_i32, %arg0 : i32, i32
  }
  func.func @transform_1(%arg0: i32) -> (i32, i32) {
    %c0_i32 = arith.constant 0 : i32
    %c0_i32_0 = arith.constant 0 : i32
    %c0_i32_1 = arith.constant 0 : i32
    return %c0_i32, %c0_i32_0 : i32, i32
  }
  func.func @transform_2(%arg0: i32) -> (i32, i32) {
    %c0_i32 = arith.constant 0 : i32
    %c0_i32_0 = arith.constant 0 : i32
    %c0_i32_1 = arith.constant 0 : i32
    return %c0_i32, %c0_i32_0 : i32, i32
  }
  func.func @transform_3(%arg0: i32) -> (i32, i32) {
    %c0_i32 = arith.constant 0 : i32
    %c0_i32_0 = arith.constant 0 : i32
    %c0_i32_1 = arith.constant 0 : i32
    return %c0_i32, %c0_i32_0 : i32, i32
  }
  func.func @transform_4(%arg0: i32) -> (i32, i32) {
    %c0_i32 = arith.constant 0 : i32
    %c0_i32_0 = arith.constant 0 : i32
    %c0_i32_1 = arith.constant 0 : i32
    return %c0_i32, %c0_i32_0 : i32, i32
  }
  func.func @transform_5(%arg0: i32) -> (i32, i32) {
    %c0_i32 = arith.constant 0 : i32
    %c0_i32_0 = arith.constant 0 : i32
    %c0_i32_1 = arith.constant 0 : i32
    return %c0_i32, %c0_i32_0 : i32, i32
  }
  func.func @transform_6(%arg0: i32) -> (i32, i32) {
    %c0_i32 = arith.constant 0 : i32
    %c0_i32_0 = arith.constant 0 : i32
    %c0_i32_1 = arith.constant 0 : i32
    return %c0_i32, %c0_i32_0 : i32, i32
  }
  func.func @transform_7(%arg0: i32) -> (i32, i32) {
    %c0_i32 = arith.constant 0 : i32
    %c0_i32_0 = arith.constant 0 : i32
    %c0_i32_1 = arith.constant 0 : i32
    return %c0_i32, %c0_i32_0 : i32, i32
  }
  func.func @transform_8(%arg0: i32) -> (i32, i32) {
    %c0_i32 = arith.constant 0 : i32
    %c0_i32_0 = arith.constant 0 : i32
    %c0_i32_1 = arith.constant 0 : i32
    return %c0_i32, %c0_i32_0 : i32, i32
  }
  func.func @transform_9(%arg0: i32) -> (i32, i32) {
    %c0_i32 = arith.constant 0 : i32
    %c0_i32_0 = arith.constant 0 : i32
    %c0_i32_1 = arith.constant 0 : i32
    return %c0_i32, %c0_i32_0 : i32, i32
  }
  func.func @transform_10(%arg0: i32) -> (i32, i32) {
    %c0_i32 = arith.constant 0 : i32
    %c0_i32_0 = arith.constant 0 : i32
    return %c0_i32, %arg0 : i32, i32
  }
}

</mosaic_0001>

<bundles_post_ra>
// kernel: neumf_forward.1
= control target key start
LH: loop header
LB: loop body
LE: loop exit
PB: predicated region body
PF: predicated region fallthrough
CT: control target
= control target key end

     0   :  { %vm81_vm0 = vcmask 523264   ;;  %v518_v2 = vmov 0   ;;  %vm197_vm1 = vcmask 261120   ;;  %v519_v45 = vmov 0.0   ;;  %s693_s0 = inlined_call_operand.vmem [shape: f32[128,128], index: 0, kind: input, shape index: {}]   ;;  %s694_s1 = inlined_call_operand.vmem [shape: f32[32,64], index: 1, kind: input, shape index: {}]   ;;  %s695_s9 = inlined_call_operand.<no memory space> [shape: f32[1,1], index: 9, kind: input, shape index: {}]   ;;  %s696_s2 = inlined_call_operand.vmem [shape: f32[32,1], index: 2, kind: input, shape index: {}]   ;;  %s697_s4 = inlined_call_operand.vmem [shape: f32[16,1], index: 4, kind: input, shape index: {}]   ;;  %s698_s8 = inlined_call_operand.vmem [shape: f32[32,1], index: 8, kind: input, shape index: {}]   ;;  %s699_s6 = inlined_call_operand.vmem [shape: f32[8,1], index: 6, kind: input, shape index: {}]   ;;  %s700_s7 = inlined_call_operand.vmem [shape: f32[8,1], index: 7, kind: input, shape index: {}]   ;;  %s701_s3 = inlined_call_operand.vmem [shape: f32[16,32], index: 3, kind: input, shape index: {}]   ;;  %s702_s5 = inlined_call_operand.vmem [shape: f32[8,16], index: 5, kind: input, shape index: {}]   ;;  %s703_s10 = inlined_call_operand.vmem [shape: f32[1,128], index: 10, kind: output, shape index: {}]  }
   0x1   :  { %v44_v0 = vld [vmem:[%s693_s0 + $0x38] sm:$0xff]  ;;  %v43_v1 = vld [vmem:[%s693_s0 + $0x30] sm:$0xff]  ;;  %512 = vset.pattern.permute.xlu0 %v518_v2  ;;  %513 = vset.pattern.permute.xlu1 %v518_v2  ;;  %v15_v3 = vstv %s695_s9  ;;  %v42_v4 = vld [vmem:[%s693_s0 + $0x28] sm:$0xff]  ;;  %vm520_vm2 = vmmov 0   ;;  %vm288_vm3 = vcmask 130048  }
   0x2   :  { %469 = vmatprep.subr.mxu0 %v44_v0  ;;  %16 = vst [vmem:[#allocation2] sm:$0x1] %v15_v3  ;;  %v53_v5 = vld [vmem:[%s694_s1] sm:$0xff]  ;;  %v60_v7 = vld [vmem:[%s696_s2 + $0x18] sm:$0xff]  ;;  %v58_v8 = vld [vmem:[%s696_s2 + $0x8] sm:$0xff] }
   0x3   :  { %470 = vmatpush3.msra.mxu0 %v44_v0  ;;  %485 = vmatprep.mubr.msk.f32.mxu0 %vm81_vm0, %v53_v5  ;;  %v41_v6 = vld [vmem:[%s693_s0 + $0x20] sm:$0xff]  ;;  %v40_v9 = vld [vmem:[%s693_s0 + $0x18] sm:$0xff]  ;;  %v59_v10 = vld [vmem:[%s696_s2 + $0x10] sm:$0xff] }
   0x4   :  { %471 = vmatprep.subr.mxu0 %v43_v1  ;;  %78 = vperm.xlu0 %512, %v60_v7   ;;  %v57_v11 = vld [vmem:[%s696_s2] sm:$0xff]  ;;  %v39_v12 = vld [vmem:[%s693_s0 + $0x10] sm:$0xff]  ;;  %v38_v13 = vld [vmem:[%s693_s0 + $0x8] sm:$0xff] }
   0x5   :  { %472 = vmatpush3.msra.mxu0 %v43_v1  ;;  %68 = vperm.xlu1 %513, %v58_v8   ;;  %v186_v14 = vld [vmem:[%s697_s4 + $0x8] sm:$0xff]  ;;  %v185_v15 = vld [vmem:[%s697_s4] sm:$0xff]  ;;  %v55_v19 = vld [vmem:[%s694_s1 + $0x10] sm:$0xff] }
   0x6   :  { %473 = vmatprep.subr.mxu0 %v42_v4  ;;  %v37_v16 = vld [vmem:[%s693_s0] sm:$0xff]  ;;  %v54_v17 = vld [vmem:[%s694_s1 + $0x8] sm:$0xff]  ;;  %v56_v21 = vld [vmem:[%s694_s1 + $0x18] sm:$0xff] }
   0x7   :  { %474 = vmatpush3.msra.mxu0 %v42_v4  ;;  %v380_v18 = vld [vmem:[%s698_s8] sm:$0xff]  ;;  %v381_v20 = vld [vmem:[%s698_s8 + $0x8] sm:$0xff]  ;;  %v382_v23 = vld [vmem:[%s698_s8 + $0x10] sm:$0xff] }
   0x8   :  { %475 = vmatprep.subr.mxu0 %v41_v6  ;;  %73 = vperm.xlu0 %512, %v59_v10   ;;  %v282_v22 = vld [vmem:[%s699_s6] sm:$0xff]  ;;  %v383_v24 = vld [vmem:[%s698_s8 + $0x18] sm:$0xff]  ;;  %v184_v44 = vld [vmem:[%s701_s3 + $0x8] sm:$0xff] }
   0x9   :  { %476 = vmatpush3.msra.mxu0 %v41_v6  ;;  %63 = vperm.xlu1 %513, %v57_v11   ;;  %v367_v25 = vld [vmem:[%s700_s7] sm:$0xff]  ;;  %v46_v58 = vld [vmem:[%s693_s0 + $0x48] sm:$0xff]  ;;  %v47_v63 = vld [vmem:[%s693_s0 + $0x50] sm:$0xff] }
   0xa   :  { %477 = vmatprep.subr.mxu0 %v40_v9  ;;  %v418_v26 = vld [vmem:[#allocation2] sm:$0x1]  ;;  %v50_v59 = vld [vmem:[%s693_s0 + $0x68] sm:$0xff]  ;;  %v51_v0 = vld [vmem:[%s693_s0 + $0x70] sm:$0xff] }
   0xb   :  { %478 = vmatpush3.msra.mxu0 %v40_v9  ;;  %v183_v27 = vld [vmem:[%s701_s3] sm:$0xff]  ;;  %v364_v62 = vmul.f32 %v50_v59, %v46_v58  ;;  %v365_v4 = vmul.f32 %v51_v0, %v47_v63  ;;  %v48_v6 = vld [vmem:[%s693_s0 + $0x58] sm:$0xff] }
   0xc   :  { %479 = vmatprep.subr.mxu0 %v39_v12  ;;  %194 = vperm.xlu0 %512, %v186_v14   ;;  %v281_v54 = vld [vmem:[%s702_s5] sm:$0xff]  ;;  %v52_v7 = vld [vmem:[%s693_s0 + $0x78] sm:$0xff] }
   0xd   :  { %480 = vmatpush3.msra.mxu0 %v39_v12  ;;  %189 = vperm.xlu1 %513, %v185_v15   ;;  %v45_v55 = vld [vmem:[%s693_s0 + $0x40] sm:$0xff]  ;;  %v366_v10 = vmul.f32 %v52_v7, %v48_v6 }
   0xe   :  { %481 = vmatprep.subr.mxu0 %v38_v13  ;;  %499 = vmatprep.mubr.msk.f32.mxu1 %vm197_vm1, %v183_v27  ;;  %v49_v57 = vld [vmem:[%s693_s0 + $0x60] sm:$0xff] }
   0xf   :  { %482 = vmatpush3.msra.mxu0 %v38_v13  ;;  %v363_v61 = vmul.f32 %v49_v57, %v45_v55 }
  0x10   :  { %483 = vmatprep.subr.mxu0 %v37_v16  ;;  %386 = vperm.xlu0 %512, %v380_v18  }
  0x11   :  { %484 = vmatpush3.msra.mxu0 %v37_v16  ;;  %391 = vperm.xlu1 %513, %v381_v20  }
  0x12   :  { %486 = vmatmul.mubr.msk.f32.vlgmr.msra.gmra.mxu0 %vm81_vm0, %v54_v17 }
  0x13   :  { %488 = vmatprep.mubr.msk.f32.mxu0 %vm81_vm0, %v55_v19 }
  0x14   :  { %285 = vperm.xlu0 %512, %v282_v22  }
  0x15   :  { %396 = vperm.xlu1 %513, %v382_v23  }
  0x16   :  { %489 = vmatmul.mubr.msk.f32.gmra.mxu0 %vm81_vm0, %v56_v21 }
  0x18   :  { %401 = vperm.xlu0 %512, %v383_v24   ;;  %v424_v24 = vlaneseq }
  0x19   :  { %370 = vperm.xlu1 %513, %v367_v25  }
  0x1c   :  { %421 = vperm.xlu0 %512, %v418_v26  }
  0x7f   :  { %v79_v28 = vpop.permute.xlu0 %78 }
  0x80   :  { %v69_v30 = vpop.permute.xlu1 %68 }
  0x83   :  { %v74_v34 = vpop.permute.xlu0 %73 }
  0x84   :  { %v64_v39 = vpop.permute.xlu1 %63 }
  0x87   :  { %v195_v46 = vpop.permute.xlu0 %194 }
  0x88   :  { %v190_v49 = vpop.permute.xlu1 %189 }
  0x8b   :  { %v387_v56 = vpop.permute.xlu0 %386 }
  0x8c   :  { %v392_v60 = vpop.permute.xlu1 %391  ;;  %v404_v2 = vmul.f32 %v387_v56, %v363_v61 }
  0x8d   :  { %v405_v3 = vmul.f32 %v392_v60, %v364_v62 }
  0x8f   :  { %v286_v1 = vpop.permute.xlu0 %285  ;;  %v408_v8 = vadd.f32 %v405_v3, %v404_v2 }
  0x90   :  { %v397_v5 = vpop.permute.xlu1 %396 }
  0x91   :  { %v406_v9 = vmul.f32 %v397_v5, %v365_v4 }
  0x93   :  { %v402_v11 = vpop.permute.xlu0 %401  ;;  %v409_v12 = vadd.f32 %v408_v8, %v406_v9 }
  0x94   :  { %v407_v13 = vmul.f32 %v402_v11, %v366_v10  ;;  %v371_v21 = vpop.permute.xlu1 %370 }
  0x96   :  { %v410_v14 = vadd.f32 %v409_v12, %v407_v13 }
  0x98   :  { %v411_v15 = vrot.slane %v410_v14, 4 }
  0x9a   :  { %v412_v17 = vadd.f32 %v411_v15, %v410_v14 }
  0x9c   :  { %v413_v22 = vrot.slane %v412_v17, 2 }
  0x9e   :  { %v414_v26 = vadd.f32 %v413_v22, %v412_v17 }
  0xd2   :  { %v487_v29 = vpop.f32.mrf.mxu0 }
  0xd3   :  { %v166_v36 = vadd.f32 %v487_v29, %v69_v30  ;;  %v415_v30 = vrot.slane %v414_v26, 1 }
  0xd4   :  { %v160_v31 = vpop.f32.mrf.mxu0 }
  0xd5   :  { %v161_v40 = vadd.f32 %v160_v31, %v64_v39  ;;  %v180_v42 = vmax.f32 %v166_v36, 0.0 }
  0xd6   :  { %v490_v32 = vpop.f32.mrf.mxu0 }
  0xd7   :  { %v176_v33 = vadd.f32 %v490_v32, %v79_v28  ;;  %v179_v43 = vmax.f32 %v161_v40, 0.0  ;;  %v425_v28 = vshrl.u32 %v424_v24, 7 }
  0xd8   :  { %v170_v35 = vpop.f32.mrf.mxu0 }
  0xd9   :  { %v182_v37 = vmax.f32 %v176_v33, 0.0  ;;  %v171_v38 = vadd.f32 %v170_v35, %v74_v34  ;;  %v426_v32 = vsub.s32 0, %v425_v28  ;;  %v422_v34 = vpop.permute.xlu0 %421  ;;  %v416_v35 = vadd.f32 %v415_v30, %v414_v26 }
  0xdb   :  { %v181_v41 = vmax.f32 %v171_v38, 0.0  ;;  %491 = vmatprep.subr.mxu1 %v182_v37 }
  0xdc   :  { %492 = vmatpush3.msra.mxu1 %v182_v37  ;;  %v427_v37 = vrot.slane %v422_v34, %v426_v32 }
  0xdd   :  { %493 = vmatprep.subr.mxu1 %v181_v41 }
  0xde   :  { %494 = vmatpush3.msra.mxu1 %v181_v41 }
  0xdf   :  { %495 = vmatprep.subr.mxu1 %v180_v42 }
  0xe0   :  { %496 = vmatpush3.msra.mxu1 %v180_v42 }
  0xe1   :  { %497 = vmatprep.subr.mxu1 %v179_v43 }
  0xe2   :  { %498 = vmatpush3.msra.mxu1 %v179_v43 }
  0xe3   :  { %500 = vmatmul.mubr.msk.f32.vlgmr.msra.gmra.mxu1 %vm197_vm1, %v184_v44  ;;  %502 = vmatprep.subr.mxu1 %v519_v45 }
  0xe4   :  { %506 = vmatprep.mubr.msk.f32.mxu1 %vm520_vm2, %v519_v45 }
 0x1a3   :  { %v501_v47 = vpop.f32.mrf.mxu1 }
 0x1a4   :  { %v276_v48 = vadd.f32 %v501_v47, %v195_v46 }
 0x1a5   :  { %v270_v50 = vpop.f32.mrf.mxu1 }
 0x1a6   :  { %v280_v51 = vmax.f32 %v276_v48, 0.0  ;;  %v271_v52 = vadd.f32 %v270_v50, %v190_v49 }
 0x1a8   :  { %v279_v53 = vmax.f32 %v271_v52, 0.0  ;;  %503 = vmatpush3.msra.mxu1 %v280_v51 }
 0x1a9   :  { %504 = vmatprep.subr.mxu1 %v519_v45 }
 0x1aa   :  { %505 = vmatpush3.msra.mxu1 %v279_v53 }
 0x1ab   :  { %507 = vmatmul.mubr.msk.f32.vlgmr.msra.gmra.mxu1 %vm288_vm3, %v281_v54 }
 0x26b   :  { %v358_v16 = vpop.f32.mrf.mxu1 }
 0x26c   :  { %v359_v18 = vadd.f32 %v358_v16, %v286_v1 }
 0x26d   :  { %v508_v19 = vpop.f32.mrf.mxu1 }
 0x26e   :  { %v362_v20 = vmax.f32 %v359_v18, 0.0 }
 0x270   :  { %v373_v23 = vmul.f32 %v371_v21, %v362_v20 }
 0x272   :  { %v374_v25 = vrot.slane %v373_v23, 4 }
 0x274   :  { %v375_v27 = vadd.f32 %v374_v25, %v373_v23 }
 0x276   :  { %v376_v29 = vrot.slane %v375_v27, 2 }
 0x278   :  { %v377_v31 = vadd.f32 %v376_v29, %v375_v27 }
 0x27a   :  { %v378_v33 = vrot.slane %v377_v31, 1 }
 0x27c   :  { %v379_v36 = vadd.f32 %v378_v33, %v377_v31 }
 0x27e   :  { %v417_v38 = vadd.f32 %v416_v35, %v379_v36 }
 0x280   :  { %v428_v39 = vadd.f32 %v427_v37, %v417_v38 }
 0x282   :  { %v447_v40 = vmul.f32 -1.442695, %v428_v39 }
 0x284   :  { %514 = vpow2.f32 %v447_v40 }
 0x291   :  { %v515_v41 = vpop.eup %514 }
 0x292   :  { %v432_v42 = vadd.f32 1.0, %v515_v41 }
 0x294   :  { %516 = vrcp.f32 %v432_v42 }
 0x2a1   :  { %v517_v43 = vpop.eup %516 }
 0x2a2   :  { %435 = vst [vmem:[%s703_s10] sm:$0x1] %v517_v43 }

</bundles_post_ra>
